<compile_context>
chip_gen: v6e
topology: v6e:2x2x1
jax: 0.10.0
libtpu: 0.0.40
codegen_flags: <defaults>
</compile_context>

<pallas_src>
import jax
import jax.numpy as jnp
from jax.experimental import pallas as pl
from jax.experimental.pallas import tpu as pltpu


# ------------------------------- config --------------------------------------
BATCH = 64       # observation rows (demo size; kernel scales to any B)
OBS_DIM = 32     # observation_space_dimensions
STATE_DIM = 128  # state_dimension (multiple of 128 -> lane-dense output)
TILE_B = 16      # batch rows per grid step (multiple of 8 sublanes)


# ------------------------------- kernel --------------------------------------
def representation_kernel(x_ref, w_ref, b_ref, o_ref):
    """Fused: y = x @ W + b ; out = (y - min_row) * (1 / scale_row).

    x_ref : (TB, Din)    observation tile (pipelined per grid step)
    w_ref : (Din, Dout)  linear weight, pre-transposed, VMEM-resident
    b_ref : (1, Dout)    linear bias, VMEM-resident
    o_ref : (TB, Dout)   normalized encoded state tile
    """
    x = x_ref[...]
    w = w_ref[...]
    b = b_ref[...]

    # nn.Linear: one MXU matmul for the whole tile, f32 accumulation.
    y = jnp.dot(x, w, preferred_element_type=jnp.float32) + b

    # scale_to_bound_action: per-row (dim 1) min/max normalization.
    mn = jnp.min(y, axis=-1, keepdims=True)
    mx = jnp.max(y, axis=-1, keepdims=True)
    scale = mx - mn
    # PyTorch: scale[scale < 1e-5] += 1e-5  (add, not clamp)
    scale = jnp.where(scale < 1e-5, scale + 1e-5, scale)
    # Narrow (TB,1) reciprocal, then one wide multiply (exact, keeps 1e-5 parity).
    inv = 1.0 / scale
    o_ref[...] = (y - mn) * inv


# ------------------------------- wrapper --------------------------------------
def representation_forward(state, weight_t, bias, *, tb=TILE_B):
    """state: (B, Din) f32; weight_t: (Din, Dout) f32; bias: (1, Dout) f32."""
    B, din = state.shape
    dout = weight_t.shape[1]

    # Batch tile: multiple of 8 sublanes, no larger than the (padded) batch.
    tb = min(tb, max(8, B))
    tb = max(8, (tb // 8) * 8)

    # Pad the batch so every block is a full, unmasked (tb, dout) tile.
    pad_b = pl.cdiv(B, tb) * tb
    if pad_b != B:
        state = jnp.pad(state, ((0, pad_b - B), (0, 0)))

    # TODO(synk): if OBS_DIM grows to a large / odd size, zero-pad the K dim
    # of weight_t (and x) to a multiple of 128 once at init for unmasked loads.
    out = pl.pallas_call(
        representation_kernel,
        out_shape=jax.ShapeDtypeStruct((pad_b, dout), jnp.float32),
        grid_spec=pltpu.PrefetchScalarGridSpec(
            num_scalar_prefetch=0,
            grid=(pad_b // tb,),
            in_specs=[
                pl.BlockSpec((tb, din), lambda i: (i, 0)),     # pipelined x
                pl.BlockSpec((din, dout), lambda i: (0, 0)),   # resident W
                pl.BlockSpec((1, dout), lambda i: (0, 0)),     # resident b
            ],
            out_specs=pl.BlockSpec((tb, dout), lambda i: (i, 0)),
        ),
        compiler_params=pltpu.CompilerParams(
            dimension_semantics=("parallel",)),   # megacore shard on v7x
    )(state, weight_t, bias)

    return out[:B]


# --------------------------- pure-JAX reference -------------------------------
def reference_forward(state, weight_t, bias):
    y = state @ weight_t + bias
    mn = jnp.min(y, axis=1, keepdims=True)
    mx = jnp.max(y, axis=1, keepdims=True)
    scale = mx - mn
    scale = jnp.where(scale < 1e-5, scale + 1e-5, scale)
    return (y - mn) / scale


# ---------------------------------- main --------------------------------------
if __name__ == "__main__":
    key = jax.random.PRNGKey(0)
    k_x, k_w, k_b = jax.random.split(key, 3)

    # deterministic example inputs
    state = jax.random.normal(k_x, (BATCH, OBS_DIM), jnp.float32)

    # nn.Linear(OBS_DIM, STATE_DIM): PyTorch weight is (out, in); store it
    # pre-transposed as (in, out) once at init so the kernel computes x @ W + b.
    w_torch = jax.random.normal(k_w, (STATE_DIM, OBS_DIM), jnp.float32) * 0.05
    weight_t = w_torch.T                                   # (OBS_DIM, STATE_DIM)
    bias = (jax.random.normal(k_b, (STATE_DIM,), jnp.float32) * 0.05
            ).reshape(1, STATE_DIM)

    out = representation_forward(state, weight_t, bias)
    out = jax.block_until_ready(out)

    ref = reference_forward(state, weight_t, bias)
    assert out.shape == (BATCH, STATE_DIM)
    assert bool(jnp.all(jnp.isfinite(out)))
    assert bool(jnp.allclose(out, ref, atol=1e-5, rtol=1e-5))
    print("KERNEL_OK")
</pallas_src>

<mosaic_0001>
module attributes {stable_mosaic.version = 11 : i64} {
  func.func @representation_kernel(%arg0: i32, %arg1: memref<16x32xf32, #tpu.memory_space<vmem>>, %arg2: memref<32x128xf32, #tpu.memory_space<vmem>>, %arg3: memref<1x128xf32, #tpu.memory_space<vmem>>, %arg4: memref<16x128xf32, #tpu.memory_space<vmem>>) attributes {dimension_semantics = [#tpu.dimension_semantics<parallel>], iteration_bounds = array<i64: 4>, scalar_prefetch = 0 : i64, scratch_operands = 0 : i64, tpu.core_type = #tpu.core_type<tc>, window_params = [{transform_indices = @transform_0, window_bounds = array<i64: 16, 32>}, {pipeline_mode = #tpu.pipeline_mode<synchronous>, transform_indices = @transform_1, window_bounds = array<i64: 32, 128>}, {pipeline_mode = #tpu.pipeline_mode<synchronous>, transform_indices = @transform_2, window_bounds = array<i64: 1, 128>}, {transform_indices = @transform_3, window_bounds = array<i64: 16, 128>}]} {
    %c0 = arith.constant 0 : index
    %c0_0 = arith.constant 0 : index
    %0 = vector.load %arg1[%c0, %c0_0] : memref<16x32xf32, #tpu.memory_space<vmem>>, vector<16x32xf32>
    %c0_1 = arith.constant 0 : index
    %c0_2 = arith.constant 0 : index
    %1 = vector.load %arg2[%c0_1, %c0_2] : memref<32x128xf32, #tpu.memory_space<vmem>>, vector<32x128xf32>
    %c0_3 = arith.constant 0 : index
    %c0_4 = arith.constant 0 : index
    %2 = vector.load %arg3[%c0_3, %c0_4] : memref<1x128xf32, #tpu.memory_space<vmem>>, vector<1x128xf32>
    %cst = arith.constant dense<0.000000e+00> : vector<16x128xf32>
    %3 = tpu.matmul %0, %1, %cst {dimension_numbers = #tpu.dot_dimension_numbers<[1], [0], [0], [1], [0, 0, 1, 1], [], []>} : vector<16x32xf32>, vector<32x128xf32>, vector<16x128xf32> -> vector<16x128xf32>
    %4 = vector.broadcast %2 : vector<1x128xf32> to vector<16x128xf32>
    %5 = arith.addf %3, %4 : vector<16x128xf32>
    %cst_5 = arith.constant dense<0x7F800000> : vector<16xf32>
    %6 = vector.multi_reduction <minimumf>, %5, %cst_5 [1] : vector<16x128xf32> to vector<16xf32>
    %7 = vector.shape_cast %6 : vector<16xf32> to vector<16x1xf32>
    %cst_6 = arith.constant dense<0xFF800000> : vector<16xf32>
    %8 = vector.multi_reduction <maximumf>, %5, %cst_6 [1] : vector<16x128xf32> to vector<16xf32>
    %9 = vector.shape_cast %8 : vector<16xf32> to vector<16x1xf32>
    %10 = arith.subf %9, %7 : vector<16x1xf32>
    %cst_7 = arith.constant 9.99999974E-6 : f32
    %11 = vector.broadcast %cst_7 : f32 to vector<16x1xf32>
    %12 = arith.cmpf olt, %10, %11 : vector<16x1xf32>
    %cst_8 = arith.constant 9.99999974E-6 : f32
    %13 = vector.broadcast %cst_8 : f32 to vector<16x1xf32>
    %14 = arith.addf %10, %13 : vector<16x1xf32>
    %15 = arith.select %12, %14, %10 : vector<16x1xi1>, vector<16x1xf32>
    %cst_9 = arith.constant 1.000000e+00 : f32
    %16 = vector.broadcast %cst_9 : f32 to vector<16x1xf32>
    %17 = arith.divf %16, %15 : vector<16x1xf32>
    %18 = vector.broadcast %7 : vector<16x1xf32> to vector<16x128xf32>
    %19 = arith.subf %5, %18 : vector<16x128xf32>
    %20 = vector.broadcast %17 : vector<16x1xf32> to vector<16x128xf32>
    %21 = arith.mulf %19, %20 : vector<16x128xf32>
    %c0_10 = arith.constant 0 : index
    %c0_11 = arith.constant 0 : index
    %22 = vector.load %arg4[%c0_10, %c0_11] : memref<16x128xf32, #tpu.memory_space<vmem>>, vector<16x128xf32>
    tpu.vector_store %arg4[%c0_10, %c0_11], %21 {strides = array<i32>} : memref<16x128xf32, #tpu.memory_space<vmem>>, vector<16x128xf32>,
    return
  }
  func.func @transform_0(%arg0: i32) -> (i32, i32) {
    %c0_i32 = arith.constant 0 : i32
    %c0_i32_0 = arith.constant 0 : i32
    return %arg0, %c0_i32 : i32, i32
  }
  func.func @transform_1(%arg0: i32) -> (i32, i32) {
    %c0_i32 = arith.constant 0 : i32
    %c0_i32_0 = arith.constant 0 : i32
    %c0_i32_1 = arith.constant 0 : i32
    return %c0_i32, %c0_i32_0 : i32, i32
  }
  func.func @transform_2(%arg0: i32) -> (i32, i32) {
    %c0_i32 = arith.constant 0 : i32
    %c0_i32_0 = arith.constant 0 : i32
    %c0_i32_1 = arith.constant 0 : i32
    return %c0_i32, %c0_i32_0 : i32, i32
  }
  func.func @transform_3(%arg0: i32) -> (i32, i32) {
    %c0_i32 = arith.constant 0 : i32
    %c0_i32_0 = arith.constant 0 : i32
    return %arg0, %c0_i32 : i32, i32
  }
}

</mosaic_0001>

<bundles_post_ra>
// kernel: tpu_custom_call.1
= control target key start
LH: loop header
LB: loop body
LE: loop exit
PB: predicated region body
PF: predicated region fallthrough
CT: control target
= control target key end

     0   :  { %8 = vsyncpa [#allocation3], 0  ;;  %s648_s0 = inlined_call_operand.vmem [shape: f32[64,32], index: 0, kind: input, shape index: {}]   ;;  %s649_s1 = inlined_call_operand.vmem [shape: f32[32,128], index: 1, kind: input, shape index: {}]   ;;  %s650_s2 = inlined_call_operand.vmem [shape: f32[1,128], index: 2, kind: input, shape index: {}]   ;;  %s651_s3 = inlined_call_operand.hbm [shape: f32[64,128], index: 3, kind: output, shape index: {}]  }
   0x1   :  { %10 = vsyncpa [#allocation3 + $0x1], 0  ;;  %s532_s12 = smov 0   ;;  %s534_s13 = smov 0  }
   0x2   :  { %s536_s14 = smov 0   ;;  %s538_s15 = smov 0  }
   0x3 LB: > { %s553_s16 = sadd.s32 4294967295, %s507_s15   ;;  %s369_s17 = sadd.s32 4294967294, %s507_s15   ;;  %s507_s15 = sphi %s538_s15, %s657_s15   ;;  %s503_s14 = sphi %s536_s14, %s656_s14   ;;  %s499_s13 = sphi %s534_s13, %s655_s13   ;;  %s495_s12 = sphi %s532_s12, %s654_s12  }
   0x4   : > { %s557_s18 = sadd.s32 1, %s507_s15   ;;  %s91_s19 = sadd.s32 1, %s503_s14 }
   0x5   : > { %s88_s20 = ssub.s32 %s507_s15, %s557_s18  ;;  %p101_p0 = scmp.ne.s32.totalorder %s503_s14, %s499_s13 }
   0x6   : > { %p89_p1 = scmp.eq.s32.totalorder %s88_s20, 0  ;;  %p102_p2 = scmp.eq.s32.totalorder %s553_s16, 3 }
   0x7   : > { %p107_p3 = scmp.ne.s32.totalorder %s499_s13, %s495_s12  ;;  %p108_p4 = scmp.eq.s32.totalorder %s369_s17, 3 }
   0x8   : > { %s568_s21 = scalar_select %p89_p1, %s503_s14, %s91_s19  }
   0x9   : > { %p570_p5 = por %p102_p2, %p101_p0  ;;  %p574_p6 = por %p108_p4, %p107_p3 }
   0xa   : > { %p372_p7 = scmp.ge.s32.totalorder %s507_s15, 1  ;;  %p141_p8 = scmp.lt.s32.totalorder %s507_s15, 5 }
   0xc   : > { %p142_p9 = pnand %p372_p7, %p141_p8 }
   0xd   : > { %s374_s28 = sshll.u32 (!%p142_p9), %s553_s16, 1  ;;  %s162_s17 = sand.u32 (!%p142_p9), 1, %s499_s13  }
   0xe   : > { %145 = sbr.rel (%p142_p9) target bundleno = 402 (0x192), region = 32  ;;  %p166_p10 = scmp.lt.s32.totalorder (!%p142_p9), %s374_s28, 7 }
   0xf   : > { %s373_s19 = sshll.u32 (!%p142_p9), %s162_s17, 4  ;;  %s384_s25 = sshll.u32 (!%p142_p9), %s553_s16, 8 }
  0x10   : > { %s164_s20 = scalar_lea.vmem (!%p142_p9), [#allocation2], %s373_s19  ;;  %s608_s29 = scalar_lea.sflag (!%p142_p9), [#allocation3], %s162_s17 }
  0x11   : > { %s307_s24 = sshll.u32 (!%p142_p9), %s164_s20, 4  ;;  %s509_s16 = smov (!%p142_p9), [#allocation2]   ;;  %s601_s24 = int_to_ptr.vmem [resolvable:$true] %s307_s24 }
  0x12   : > { %s447_s30 = scalar_lea.vmem (!%p142_p9), %s601_s24, 256  ;;  %s451_s4 = sshll.u32 (!%p142_p9), %s509_s16, 4  ;;  %s452_s4 = int_to_ptr.vmem [resolvable:$false] %s451_s4 }
  0x13   : > { %v177_v0 = vld [vmem:[%s649_s1 + $0x18] sm:$0xff]  ;;  %v176_v1 = vld [vmem:[%s649_s1 + $0x10] sm:$0xff]  ;;  %v175_v2 = vld [vmem:[%s649_s1 + $0x8] sm:$0xff]  ;;  %s659_s28 = smov (!%p166_p10, %s374_s28), 7  ;;  %vm185_vm0 = vcmask 261120   ;;  %p448_p11 = scmp.ne.s32.totalorder %s601_s24, %s447_s30 }
  0x14   : > { %391 = vmatprep.subr.mxu0 %v177_v0  ;;  %v174_v3 = vld [vmem:[%s649_s1] sm:$0xff]  ;;  %s375_s6 = sshll.u32 %s659_s28, 3  ;;  %s606_s28 = scalar_lea.hbm %s651_s3, %s384_s25 }
  0x15   : > { %392 = vmatpush3.msra.mxu0 %v177_v0  ;;  %s169_s9 = scalar_lea.vmem %s648_s0, %s375_s6  ;;  %v376_v7 = vld [vmem:[%s650_s2] ss:$0 sm:$0xff]  ;;  %p449_p12 = pnand %p448_p11, %p570_p5 }
  0x16   : > { %393 = vmatprep.subr.mxu0 %v176_v1  ;;  %v172_v4 = vld [vmem:[%s169_s9] sm:$0xff]  ;;  %v173_v5 = vld [vmem:[%s169_s9 + $0x8] sm:$0xff]  ;;  %s453_s5 = scalar_lea.vmem %s452_s4, 512  ;;  %p454_p0 = scmp.lt.s32.totalorder %s601_s24, %s452_s4 }
  0x17   : > { %394 = vmatpush3.msra.mxu0 %v176_v1  ;;  %399 = vmatprep.mubr.msk.f32.mxu0 %vm185_vm0, %v172_v4  ;;  %p450_p13 = pneg %p449_p12  ;;  %p455_p1 = scmp.lt.s32.totalorder %s453_s5, %s447_s30 }
  0x18   : > { %395 = vmatprep.subr.mxu0 %v175_v2 }
  0x19   : > { %396 = vmatpush3.msra.mxu0 %v175_v2  ;;  %p456_p2 = por %p455_p1, %p454_p0 }
  0x1a   : > { %397 = vmatprep.subr.mxu0 %v174_v3 }
  0x1b   : > { %398 = vmatpush3.msra.mxu0 %v174_v3  ;;  %p457_p3 = pnand %p456_p2, %p450_p13 }
  0x1c   : > { %400 = vmatmul.mubr.msk.f32.vlgmr.msra.gmra.mxu0 %vm185_vm0, %v173_v5 }
  0xdc   : > { %v401_v6 = vpop.f32.mrf.mxu0 }
  0xdd   : > { %v264_v10 = vadd.f32 %v401_v6, %v376_v7 }
  0xde   : > { %v258_v8 = vpop.f32.mrf.mxu0 }
  0xdf   : > { %v259_v9 = vadd.f32 %v376_v7, %v258_v8 }
  0xe1   : > { %271 = vmax.xlane.f32.xlu1 %v259_v9  ;;  %267 = vmin.xlane.f32.xlu0 %v259_v9 }
  0xe5   : > { %273 = vmax.xlane.f32.xlu1 %v264_v10  ;;  %269 = vmin.xlane.f32.xlu0 %v264_v10 }
 0x16a   : > { %v272_v11 = vpop.xlane.xlu1 %271  ;;  %v268_v12 = vpop.xlane.xlu0 %267 }
 0x16b   : > { %v275_v13 = vsub.f32 %v272_v11, %v268_v12  ;;  %v287_v21 = vsub.f32 %v259_v9, %v268_v12 }
 0x16d   : > { %vm277_vm1 = vcmp.lt.f32.partialorder %v275_v13, 1e-05  ;;  %v279_v14 = vadd.f32 1e-05, %v275_v13 }
 0x16e   : > { %v274_v15 = vpop.xlane.xlu1 %273  ;;  %v270_v16 = vpop.xlane.xlu0 %269 }
 0x16f   : > { %v281_v17 = vsel %vm277_vm1, %v279_v14, %v275_v13  ;;  %v276_v18 = vsub.f32 %v274_v15, %v270_v16  ;;  %v288_v24 = vsub.f32 %v264_v10, %v270_v16 }
 0x170   : > { %443 = vrcp.f32 %v281_v17 }
 0x171   : > { %vm278_vm2 = vcmp.lt.f32.partialorder %v276_v18, 1e-05  ;;  %v280_v19 = vadd.f32 1e-05, %v276_v18 }
 0x173   : > { %v282_v20 = vsel %vm278_vm2, %v280_v19, %v276_v18 }
 0x174   : > { %445 = vrcp.f32 %v282_v20 }
 0x17d   : > { %v444_v22 = vpop.eup %443 }
 0x17e   : > { %v289_v23 = vmul.f32 %v444_v22, %v287_v21 }
 0x180   : > { %291 = vst [vmem:[%s164_s20] sm:$0xff] %v289_v23 }
 0x181   : > { %v446_v25 = vpop.eup %445 }
 0x182   : > { %v290_v26 = vmul.f32 %v446_v25, %v288_v24 }
 0x184   : > { %292 = vst [vmem:[%s164_s20 + $0x8] sm:$0xff] %v290_v26 }
 0x185   : > { %460 = shalt.err (!%p457_p3)
}
 0x186   : > { %s461_s6 = scalar_lea.hbm %s606_s28, 256  ;;  %s465_s9 = scalar_lea.hbm %s651_s3, 1024 }
 0x187   : > { %p462_p4 = scmp.ne.s32.totalorder %s606_s28, %s461_s6  ;;  %p466_p9 = scmp.lt.s32.totalorder %s606_s28, %s651_s3 }
 0x188   : > { %p467_p10 = scmp.lt.s32.totalorder %s465_s9, %s461_s6 }
 0x189   : > { %p463_p7 = pnand %p462_p4, %p570_p5 }
 0x18a   : > { %p468_p11 = por %p467_p10, %p466_p9 }
 0x18b   : > { %p464_p8 = pneg %p463_p7 }
 0x18d   : > { %p469_p12 = pnand %p468_p11, %p464_p8 }
 0x18f   : > { %472 = shalt.err (!%p469_p12)
}
 0x190   : > { %s510_s17 = smov 128   ;;  %s511_s19 = smov 8  }
 0x191   : > { %402 = dma.vmem_to_hbm [thread:$0]  (%p570_p5), %s601_s24, 256, %s606_s28, %s608_s29, %s510_s17, %s510_s17, %s511_s19  }
 0x192 PF: > { %p408_p13 = scmp.ge.s32.totalorder %s507_s15, 2  ;;  %s322_s20 = sand.u32 1, %s495_s12  }
 0x193   : > { %s323_s25 = scalar_lea.sflag [#allocation3], %s322_s20 }
 0x194   : > { %p405_p0 = pnand %p408_p13, %p574_p6 }
 0x196   : > { %p406_p1 = pneg %p405_p0 }
 0x198   : > { %490 = dma.done.wait (%p406_p1), %s323_s25, 256  }
 0x199   : > { %492 = vsyncadd (%p406_p1), %s323_s25, 4294967040  ;;  %p13_p2 = scmp.ge.s32.totalorder %s557_s18, 6   ;;  %s654_s12 = smov %s499_s13 }
 0x19a   : > { %s655_s13 = smov %s503_s14  ;;  %s656_s14 = smov %s568_s21 }
 0x19b   : > { %s657_s15 = smov %s557_s18  ;;  %15 = sbr.rel (!%p13_p2) target bundleno = 3 (0x3), region = 67 }
 0x1a0   :  { %328 = vsyncpa [#allocation3], 1 }
 0x1a1   :  { %330 = vsyncpa [#allocation3 + $0x1], 1 }

</bundles_post_ra>
